<compile_context>
chip_gen: v6e
topology: v6e:2x2x1
jax: 0.10.0
libtpu: 0.0.40
codegen_flags: <defaults>
</compile_context>

<pallas_src>
import functools

import jax
import jax.numpy as jnp
import numpy as np
from jax.experimental import pallas as pl
from jax.experimental.pallas import tpu as pltpu


def _round_up(v: int, m: int) -> int:
    return (v + m - 1) // m * m


def _denominator(d_model: int) -> np.ndarray:
    """denom[d] = 10000 ** (2 * (d // 2) / d_model) — matches the torch __init__."""
    exp = 2.0 * (np.arange(d_model) // 2).astype(np.float64) / float(d_model)
    return np.power(10000.0, exp).astype(np.float32)


def _build_pe_reference(d_model: int, seq_length: int) -> np.ndarray:
    """Plain-numpy replica of the PyTorch `pe` buffer (used only for checking)."""
    denom = _denominator(d_model)
    pos = (np.arange(seq_length, dtype=np.float32)[:, None] / denom).astype(np.float32)
    pe = pos.copy()
    pe[:, 0::2] = np.sin(pos[:, 0::2])
    pe[:, 1::2] = np.cos(pos[:, 1::2])
    return pe.astype(np.float32)


def _fourier_kernel(seed_ref, x_ref, denom_ref, even_ref, col_ref, rowoff_ref,
                    o_ref, *, p: float, rows_per_vrow: int, d_total: int):
    """out = dropout(x + pe * x); pe recomputed in-kernel from (row, col)."""
    tn, lanes = x_ref.shape

    # Original (row, col) of every element in this (possibly lane-flattened) block.
    vrow = pl.program_id(0) * tn + jax.lax.broadcasted_iota(jnp.int32, (tn, lanes), 0)
    row = vrow * rows_per_vrow + rowoff_ref[...]                 # (tn, lanes) int32

    # Positional encoding on the fly: sin(row/denom) on even cols, cos on odd.
    angle = row.astype(jnp.float32) / denom_ref[...]
    pe = jnp.where(even_ref[...] != 0.0, jnp.sin(angle), jnp.cos(angle))

    x = x_ref[...].astype(jnp.float32)
    val = x + pe * x

    if p >= 1.0:
        # Everything dropped: avoid the 1/(1-p) overflow flagged in review.
        val = jnp.zeros_like(val)
    elif p > 0.0:
        # Stateless counter-based hash -> uniform in [0, 1).  Depends only on
        # (seed, global element id), so the mask is reproducible across tilings
        # and every grid tile is independent.  int32-only ops (logical shifts
        # emulated with mask) for maximum Mosaic/interpreter compatibility.
        elem = row * d_total + col_ref[...]
        h = elem ^ (seed_ref[0] * (-1640531527))                 # 0x9E3779B9
        h = (h ^ ((h >> 16) & 0xFFFF)) * 2146121005              # 0x7FEB352D
        h = (h ^ ((h >> 15) & 0x1FFFF)) * (-2073254261)          # 0x846CA68B
        h = h ^ ((h >> 16) & 0xFFFF)
        u = ((h >> 8) & 0xFFFFFF).astype(jnp.float32) * (1.0 / (1 << 24))
        keep = u >= p
        val = jnp.where(keep, val * (1.0 / (1.0 - p)), 0.0)

    o_ref[...] = val.astype(o_ref.dtype)


def make_fourier_encoder_2d(dropout_probability: float, d_model: int,
                            seq_length: int, row_tile: int | None = None):
    """Returns fn(x, seed=0) implementing FourierEncoder2d.forward.

    `row_tile` is a test/tuning knob overriding the byte-targeted tile size.
    """
    p = float(dropout_probability)
    denom_full = _denominator(d_model)
    del seq_length  # pe is recomputed analytically; any N works.

    # TODO(synk): `self._positional_encoding(N, D)` is not defined in the reference
    # source; we assume it returns self.pe[:N, :D] (recomputed analytically here).

    def forward(x: jnp.ndarray, seed=0) -> jnp.ndarray:
        N, D = x.shape
        if D > d_model:
            raise ValueError(f"D={D} exceeds d_model={d_model}")

        # ---- choose a lane-dense layout ------------------------------------
        if D < 128 and 128 % D == 0 and (N * D) % 128 == 0:
            # View (N, D) as (N*D/128, 128): full 128-lane loads/stores.
            lanes = 128
            rows_per_vrow = 128 // D          # original rows per kernel row
            rows = (N * D) // 128
            xk = x.reshape(rows, lanes)       # free row-major reshape
            lane = np.arange(lanes)
            col = lane % D
            rowoff = lane // D
        else:
            lanes = D
            rows_per_vrow = 1
            rows = N
            xk = x
            col = np.arange(D)
            rowoff = np.zeros(D, dtype=np.int64)

        denom_lane = jnp.asarray(denom_full[col].reshape(1, lanes), dtype=jnp.float32)
        even_lane = jnp.asarray(((col % 2) == 0).reshape(1, lanes), dtype=jnp.float32)
        col_lane = jnp.asarray(col.reshape(1, lanes), dtype=jnp.int32)
        rowoff_lane = jnp.asarray(rowoff.reshape(1, lanes), dtype=jnp.int32)

        # ---- row tile: ~2 MiB per input block, always a multiple of 8 ------
        itemsize = int(np.dtype(x.dtype).itemsize)
        target_bytes = 2 * 1024 * 1024
        if rows <= 8:
            tn = rows                                   # tiny input: full-array block
        elif row_tile is not None:
            tn = _round_up(min(int(row_tile), rows), 8)
        else:
            by_bytes = (target_bytes // (lanes * itemsize)) // 8 * 8
            tn = int(max(8, min(_round_up(rows, 8), by_bytes)))
        grid = (pl.cdiv(rows, tn),)

        seed_arr = jnp.asarray(seed, dtype=jnp.int32).reshape((1,))
        kernel = functools.partial(_fourier_kernel, p=p,
                                   rows_per_vrow=rows_per_vrow, d_total=D)

        out = pl.pallas_call(
            kernel,
            out_shape=jax.ShapeDtypeStruct((rows, lanes), x.dtype),
            grid=grid,
            in_specs=[
                pl.BlockSpec(memory_space=pltpu.MemorySpace.SMEM),   # seed (scalar)
                pl.BlockSpec((tn, lanes), lambda i: (i, 0)),         # x tile
                pl.BlockSpec((1, lanes), lambda i: (0, 0)),          # denom per lane
                pl.BlockSpec((1, lanes), lambda i: (0, 0)),          # even/odd mask
                pl.BlockSpec((1, lanes), lambda i: (0, 0)),          # orig col per lane
                pl.BlockSpec((1, lanes), lambda i: (0, 0)),          # row offset per lane
            ],
            out_specs=pl.BlockSpec((tn, lanes), lambda i: (i, 0)),
            compiler_params=pltpu.CompilerParams(
                dimension_semantics=("parallel",),       # tiles are independent
                vmem_limit_bytes=32 * 1024 * 1024),      # safe on v5e/v6e/v7x
        )(seed_arr, xk, denom_lane, even_lane, col_lane, rowoff_lane)

        return out.reshape(N, D)

    return forward


if __name__ == "__main__":
    # ---- 1) small shape from the module: x is (N, D) = (seq, d_model) ------
    seq_length, d_model = 8, 32
    x = jax.random.normal(jax.random.PRNGKey(0), (seq_length, d_model),
                          dtype=jnp.float32)

    enc_eval = make_fourier_encoder_2d(0.0, d_model, seq_length)
    out = jax.block_until_ready(enc_eval(x))
    pe = _build_pe_reference(d_model, seq_length)
    expected = np.asarray(x) + pe * np.asarray(x)
    np.testing.assert_allclose(np.asarray(out), expected, rtol=1e-5, atol=1e-5)

    # ---- 2) lane-flattened path with a multi-step grid ----------------------
    n2, d2 = 64, 32
    x2 = jax.random.normal(jax.random.PRNGKey(1), (n2, d2), dtype=jnp.float32)
    out2 = jax.block_until_ready(make_fourier_encoder_2d(0.0, d2, n2, row_tile=8)(x2))
    pe2 = _build_pe_reference(d2, n2)
    np.testing.assert_allclose(np.asarray(out2),
                               np.asarray(x2) + pe2 * np.asarray(x2),
                               rtol=1e-5, atol=1e-5)

    # ---- 3) plain 2-D path, ragged N (partial edge block, no full-array tile)
    n3, d3 = 20, 128
    x3 = jax.random.normal(jax.random.PRNGKey(2), (n3, d3), dtype=jnp.float32)
    out3 = jax.block_until_ready(make_fourier_encoder_2d(0.0, d3, n3, row_tile=8)(x3))
    pe3 = _build_pe_reference(d3, n3)
    np.testing.assert_allclose(np.asarray(out3),
                               np.asarray(x3) + pe3 * np.asarray(x3),
                               rtol=1e-5, atol=1e-5)

    # ---- 4) dropout path (training, p=0.1) via in-kernel stateless hash -----
    enc_train = make_fourier_encoder_2d(0.1, d_model, seq_length)
    out_drop = jax.block_until_ready(enc_train(x, seed=123))
    assert out_drop.shape == x.shape and out_drop.dtype == x.dtype
    od = np.asarray(out_drop)
    n_zero = int(np.sum(od == 0.0))
    assert 1 <= n_zero <= 128, f"unexpected dropout zero count: {n_zero}"
    kept = od != 0.0
    np.testing.assert_allclose(od[kept], (expected / 0.9)[kept],
                               rtol=1e-4, atol=1e-5)

    # ---- 5) p == 1.0 must give all zeros (no inf scaling) -------------------
    out_all = jax.block_until_ready(
        make_fourier_encoder_2d(1.0, d_model, seq_length)(x, seed=7))
    assert np.all(np.asarray(out_all) == 0.0)

    print("KERNEL_OK")
</pallas_src>

<mosaic_0001>
module attributes {stable_mosaic.version = 11 : i64} {
  func.func @_fourier_kernel(%arg0: i32, %arg1: memref<1xi32, #tpu.memory_space<smem>>, %arg2: memref<2x128xf32, #tpu.memory_space<vmem>>, %arg3: memref<1x128xf32, #tpu.memory_space<vmem>>, %arg4: memref<1x128xf32, #tpu.memory_space<vmem>>, %arg5: memref<1x128xi32, #tpu.memory_space<vmem>>, %arg6: memref<1x128xi32, #tpu.memory_space<vmem>>, %arg7: memref<2x128xf32, #tpu.memory_space<vmem>>) attributes {dimension_semantics = [#tpu.dimension_semantics<parallel>], iteration_bounds = array<i64: 1>, scalar_prefetch = 0 : i64, scratch_operands = 0 : i64, tpu.core_type = #tpu.core_type<tc>, window_params = [{transform_indices = @transform_0, window_bounds = array<i64: 1>}, {transform_indices = @transform_1, window_bounds = array<i64: 2, 128>}, {pipeline_mode = #tpu.pipeline_mode<synchronous>, transform_indices = @transform_2, window_bounds = array<i64: 1, 128>}, {pipeline_mode = #tpu.pipeline_mode<synchronous>, transform_indices = @transform_3, window_bounds = array<i64: 1, 128>}, {pipeline_mode = #tpu.pipeline_mode<synchronous>, transform_indices = @transform_4, window_bounds = array<i64: 1, 128>}, {pipeline_mode = #tpu.pipeline_mode<synchronous>, transform_indices = @transform_5, window_bounds = array<i64: 1, 128>}, {transform_indices = @transform_6, window_bounds = array<i64: 2, 128>}]} {
    %c2_i32 = arith.constant 2 : i32
    %0 = arith.muli %arg0, %c2_i32 : i32
    %1 = tpu.iota {dimensions = array<i32: 0>} : vector<2x128xi32>
    %2 = vector.broadcast %0 : i32 to vector<2x128xi32>
    %3 = arith.addi %2, %1 : vector<2x128xi32>
    %c4_i32 = arith.constant 4 : i32
    %4 = vector.broadcast %c4_i32 : i32 to vector<2x128xi32>
    %5 = arith.muli %3, %4 : vector<2x128xi32>
    %c0 = arith.constant 0 : index
    %c0_0 = arith.constant 0 : index
    %6 = vector.load %arg6[%c0, %c0_0] : memref<1x128xi32, #tpu.memory_space<vmem>>, vector<1x128xi32>
    %7 = vector.broadcast %6 : vector<1x128xi32> to vector<2x128xi32>
    %8 = arith.addi %5, %7 : vector<2x128xi32>
    %9 = arith.sitofp %8 : vector<2x128xi32> to vector<2x128xf32>
    %c0_1 = arith.constant 0 : index
    %c0_2 = arith.constant 0 : index
    %10 = vector.load %arg3[%c0_1, %c0_2] : memref<1x128xf32, #tpu.memory_space<vmem>>, vector<1x128xf32>
    %11 = vector.broadcast %10 : vector<1x128xf32> to vector<2x128xf32>
    %12 = arith.divf %9, %11 : vector<2x128xf32>
    %c0_3 = arith.constant 0 : index
    %c0_4 = arith.constant 0 : index
    %13 = vector.load %arg4[%c0_3, %c0_4] : memref<1x128xf32, #tpu.memory_space<vmem>>, vector<1x128xf32>
    %cst = arith.constant 0.000000e+00 : f32
    %14 = vector.broadcast %cst : f32 to vector<1x128xf32>
    %15 = arith.cmpf one, %13, %14 : vector<1x128xf32>
    %16 = math.sin %12 : vector<2x128xf32>
    %17 = math.cos %12 : vector<2x128xf32>
    %18 = vector.shape_cast %15 : vector<1x128xi1> to vector<1x128xi1>
    %19 = vector.broadcast %18 : vector<1x128xi1> to vector<2x128xi1>
    %20 = arith.select %19, %16, %17 : vector<2x128xi1>, vector<2x128xf32>
    %c0_5 = arith.constant 0 : index
    %c0_6 = arith.constant 0 : index
    %21 = vector.load %arg2[%c0_5, %c0_6] : memref<2x128xf32, #tpu.memory_space<vmem>>, vector<2x128xf32>
    %22 = arith.mulf %20, %21 : vector<2x128xf32>
    %23 = arith.addf %21, %22 : vector<2x128xf32>
    %c0_7 = arith.constant 0 : index
    %c0_8 = arith.constant 0 : index
    %24 = vector.load %arg7[%c0_7, %c0_8] : memref<2x128xf32, #tpu.memory_space<vmem>>, vector<2x128xf32>
    tpu.vector_store %arg7[%c0_7, %c0_8], %23 {strides = array<i32>} : memref<2x128xf32, #tpu.memory_space<vmem>>, vector<2x128xf32>,
    return
  }
  func.func @transform_0(%arg0: i32) -> i32 {
    %c0_i32 = arith.constant 0 : i32
    %c0_i32_0 = arith.constant 0 : i32
    return %c0_i32 : i32
  }
  func.func @transform_1(%arg0: i32) -> (i32, i32) {
    %c0_i32 = arith.constant 0 : i32
    %c0_i32_0 = arith.constant 0 : i32
    return %arg0, %c0_i32 : i32, i32
  }
  func.func @transform_2(%arg0: i32) -> (i32, i32) {
    %c0_i32 = arith.constant 0 : i32
    %c0_i32_0 = arith.constant 0 : i32
    %c0_i32_1 = arith.constant 0 : i32
    return %c0_i32, %c0_i32_0 : i32, i32
  }
  func.func @transform_3(%arg0: i32) -> (i32, i32) {
    %c0_i32 = arith.constant 0 : i32
    %c0_i32_0 = arith.constant 0 : i32
    %c0_i32_1 = arith.constant 0 : i32
    return %c0_i32, %c0_i32_0 : i32, i32
  }
  func.func @transform_4(%arg0: i32) -> (i32, i32) {
    %c0_i32 = arith.constant 0 : i32
    %c0_i32_0 = arith.constant 0 : i32
    %c0_i32_1 = arith.constant 0 : i32
    return %c0_i32, %c0_i32_0 : i32, i32
  }
  func.func @transform_5(%arg0: i32) -> (i32, i32) {
    %c0_i32 = arith.constant 0 : i32
    %c0_i32_0 = arith.constant 0 : i32
    %c0_i32_1 = arith.constant 0 : i32
    return %c0_i32, %c0_i32_0 : i32, i32
  }
  func.func @transform_6(%arg0: i32) -> (i32, i32) {
    %c0_i32 = arith.constant 0 : i32
    %c0_i32_0 = arith.constant 0 : i32
    return %arg0, %c0_i32 : i32, i32
  }
}

</mosaic_0001>

<bundles_post_ra>
// kernel: tpu_custom_call.1
= control target key start
LH: loop header
LB: loop body
LE: loop exit
PB: predicated region body
PF: predicated region fallthrough
CT: control target
= control target key end

     0   :  { %12 = vsyncpa [#allocation4], 0  ;;  %v26_v0 = vlaneseq  ;;  %v331_v20 = vmov 683565275   ;;  %v332_v22 = vmov 2475754826   ;;  %s414_s0 = inlined_call_operand.<no memory space> [shape: s32[1], index: 0, kind: input, shape index: {}]   ;;  %s415_s1 = inlined_call_operand.vmem [shape: f32[2,128], index: 1, kind: input, shape index: {}]   ;;  %s416_s2 = inlined_call_operand.vmem [shape: f32[1,128], index: 2, kind: input, shape index: {}]   ;;  %s417_s3 = inlined_call_operand.vmem [shape: f32[1,128], index: 3, kind: input, shape index: {}]   ;;  %s418_s4 = inlined_call_operand.vmem [shape: s32[1,128], index: 4, kind: input, shape index: {}]   ;;  %s419_s5 = inlined_call_operand.vmem [shape: s32[1,128], index: 5, kind: input, shape index: {}]   ;;  %s420_s6 = inlined_call_operand.hbm [shape: f32[2,128], index: 6, kind: output, shape index: {}]  }
   0x1   :  { %v282_v1 = vld [vmem:[%s416_s2] ss:$0 sm:$0xff]  ;;  %v333_v24 = vmov 2131351028   ;;  %v334_v26 = vmov 2102212464  }
   0x2   :  { %303 = vrcp.f32 %v282_v1  ;;  %v377_v2 = vshrl.u32 %v26_v0, 7  ;;  %v281_v4 = vld [vmem:[%s419_s5] ss:$0 sm:$0xff]  ;;  %v335_v28 = vmov 920167782   ;;  %s338_s24 = smov [#allocation3]  }
   0x3   :  { %v336_v35 = vmov 1326507024   ;;  %s273_s25 = sshll.u32 %s338_s24, 4  ;;  %s274_s25 = int_to_ptr.vmem [resolvable:$true] %s273_s25 }
   0x4   :  { %v30_v3 = vmul.u32 4, %v377_v2  ;;  %s309_s26 = scalar_lea.vmem %s274_s25, 32  ;;  %p314_p1 = scmp.lt.s32.totalorder %s274_s25, %s274_s25 }
   0x5   :  { %p310_p0 = scmp.ne.s32.totalorder %s274_s25, %s309_s26  ;;  %p315_p2 = scmp.lt.s32.totalorder %s309_s26, %s309_s26 }
   0x6   :  { %v36_v5 = vadd.s32 %v281_v4, %v30_v3 }
   0x7   :  { %p316_p3 = por %p315_p2, %p314_p1 }
   0x8   :  { %v37_v6 = vcvt.s32.f32 %v36_v5 }
   0x9   :  { %p317_p4 = pnand %p316_p3, %p310_p0 }
   0xf   :  { %v304_v7 = vpop.eup %303 }
  0x10   :  { %v383_v8 = vmul.f32 %v304_v7, %v37_v6 }
  0x12   :  { %v52_v9 = vand.u32 2139095040, %v383_v8  ;;  %v49_v11 = vand.u32 2147483647, %v383_v8  ;;  %vm51_vm7 = vcmp.lt.s32.totalorder %v383_v8, 0 }
  0x14   :  { %v53_v10 = vshrl.u32 %v52_v9, 23  ;;  %v56_v14 = vand.u32 8388607, %v49_v11  ;;  %vm50_vm8 = vcmp.le.f32.partialorder %v49_v11, 0.7853982 }
  0x16   :  { %v283_v12 = vadd.s32 4294967169, %v53_v10  ;;  %v57_v17 = vor.u32 8388608, %v56_v14 }
  0x18   :  { %v59_v13 = vadd.s32 1, %v283_v12  ;;  %v97_v37 = vshll.u32 %v57_v17, 8 }
  0x1a   :  { %vm60_vm0 = vcmp.gt.s32.totalorder %v59_v13, 0 }
  0x1b   :  { %v61_v15 = vsel %vm60_vm0, %v59_v13, 0  ;;  %vm141_vm0 = vweird.f32 %v383_v8 }
  0x1c   :  { %v63_v16 = vand.u32 31, %v61_v15  ;;  %v62_v18 = vshrl.u32 %v61_v15, 5 }
  0x1e   :  { %v64_v19 = vsub.s32 32, %v63_v16  ;;  %v66_v21 = vshll.u32 %v331_v20, %v63_v16  ;;  %v69_v23 = vshll.u32 %v332_v22, %v63_v16  ;;  %v72_v25 = vshll.u32 %v333_v24, %v63_v16 }
  0x1f   :  { %v75_v27 = vshll.u32 %v334_v26, %v63_v16  ;;  %v78_v29 = vshll.u32 %v335_v28, %v63_v16  ;;  %vm81_vm1 = vcmp.lt.s32.totalorder %v62_v18, 1  ;;  %vm84_vm2 = vcmp.lt.s32.totalorder %v62_v18, 4 }
  0x20   :  { %v65_v30 = vshrl.u32 %v331_v20, %v64_v19  ;;  %v67_v31 = vshrl.u32 %v332_v22, %v64_v19  ;;  %v70_v32 = vshrl.u32 %v333_v24, %v64_v19  ;;  %v73_v33 = vshrl.u32 %v334_v26, %v64_v19 }
  0x21   :  { %v76_v34 = vshrl.u32 %v335_v28, %v64_v19  ;;  %v79_v36 = vshrl.u32 %v336_v35, %v64_v19  ;;  %vm82_vm3 = vcmp.lt.s32.totalorder %v62_v18, 2  ;;  %vm83_vm4 = vcmp.lt.s32.totalorder %v62_v18, 3 }
  0x22   :  { %v68_v38 = vor.u32 %v67_v31, %v66_v21  ;;  %v71_v39 = vor.u32 %v70_v32, %v69_v23  ;;  %v74_v40 = vor.u32 %v73_v33, %v72_v25  ;;  %v259_v33 = vsub.s32 0, %v377_v2 }
  0x23   :  { %v77_v41 = vor.u32 %v76_v34, %v75_v27  ;;  %v80_v42 = vor.u32 %v79_v36, %v78_v29  ;;  %v47_v29 = vld [vmem:[%s417_s3] sm:$0x1]  ;;  %v337_v34 = vmov 0  }
  0x24   :  { %v85_v43 = vsel %vm81_vm1, %v65_v30, %v68_v38  ;;  %v86_v44 = vsel %vm84_vm2, %v74_v40, 2102212464  ;;  %v89_v45 = vsel %vm81_vm1, %v68_v38, %v71_v39  ;;  %v93_v46 = vsel %vm81_vm1, %v71_v39, %v74_v40 }
  0x25   :  { %v87_v47 = vsel %vm83_vm4, %v71_v39, %v86_v44  ;;  %v90_v48 = vsel %vm84_vm2, %v77_v41, 920167782  ;;  %v94_v49 = vsel %vm84_vm2, %v80_v42, 1326507024  ;;  %vm48_vm9 = vcmp.ne.f32.partialorder %v47_v29, 0.0 }
  0x26   :  { %v91_v50 = vsel %vm83_vm4, %v74_v40, %v90_v48  ;;  %v95_v51 = vsel %vm83_vm4, %v77_v41, %v94_v49  ;;  %v88_v52 = vsel %vm82_vm3, %v85_v43, %v87_v47  ;;  %v256_v11 = vsel %vm48_vm9, 1, %v337_v34 }
  0x27   :  { %v92_v53 = vsel %vm82_vm3, %v89_v45, %v91_v50  ;;  %v96_v54 = vsel %vm82_vm3, %v93_v46, %v95_v51  ;;  %v104_v59 = vmul.u32 %v97_v37, %v88_v52  ;;  %v260_v36 = vrot.slane %v256_v11, %v259_v33  ;;  %v263_v45 = vld [vmem:[%s415_s1] sm:$0x3] }
  0x28   :  { %v389_v55 = vmul.u32.u64.low %v97_v37, %v96_v54  ;;  %v390_v56 = vmul.u32.u64.high %v97_v37, %v96_v54, %v389_v55  ;;  %v392_v57 = vmul.u32.u64.low %v97_v37, %v92_v53  ;;  %v393_v58 = vmul.u32.u64.high %v97_v37, %v92_v53, %v392_v57 }
  0x29   :  { %vm261_vm1 = vcmp.eq.s32.totalorder %v260_v36, 1 }
  0x2a   :  { %vm106_vm5 = vc.u32 %v390_v56, %v392_v57  ;;  %v107_v60 = vadd.s32 1, %v393_v58  ;;  %v105_v9 = vadd.s32 %v392_v57, %v390_v56 }
  0x2c   :  { %v108_v61 = vsel %vm106_vm5, %v107_v60, %v393_v58 }
  0x2d   :  { %v109_v62 = vadd.s32 %v108_v61, %v104_v59 }
  0x2f   :  { %v110_v63 = vadd.s32 536870912, %v109_v62 }
  0x31   :  { %v111_v0 = vshrl.u32 %v110_v63, 30 }
  0x33   :  { %v112_v1 = vshll.u32 %v111_v0, 30  ;;  %v135_v23 = vsub.s32 4, %v111_v0 }
  0x35   :  { %v113_v3 = vsub.s32 %v109_v62, %v112_v1  ;;  %v136_v26 = vsel %vm51_vm7, %v135_v23, %v111_v0 }
  0x36   :  { %v138_v28 = vsel %vm50_vm8, 0, %v136_v26 }
  0x37   :  { %v115_v4 = vsub.s32 0, %v113_v3  ;;  %v142_v30 = vadd.s32 3, %v138_v28  ;;  %v246_v32 = vand.u32 3, %v138_v28 }
  0x39   :  { %v284_v5 = vmin.u32 %v115_v4, %v113_v3  ;;  %v143_v31 = vand.u32 3, %v142_v30  ;;  %vm251_vm11 = vcmp.eq.s32.totalorder %v246_v32, 2  ;;  %vm248_vm13 = vcmp.eq.s32.totalorder %v246_v32, 0 }
  0x3a   :  { %vm247_vm15 = vcmp.lt.s32.totalorder %v246_v32, 2 }
  0x3b   :  { %v117_v6 = vclz %v284_v5  ;;  %vm148_vm10 = vcmp.eq.s32.totalorder %v143_v31, 2  ;;  %vm145_vm12 = vcmp.eq.s32.totalorder %v143_v31, 0  ;;  %vm144_vm14 = vcmp.lt.s32.totalorder %v143_v31, 2 }
  0x3d   :  { %v285_v7 = vadd.s32 4294967294, %v117_v6 }
  0x3f   :  { %vm286_vm6 = vcmp.lt.s32.totalorder %v285_v7, 0 }
  0x40   :  { %v120_v10 = vsel %vm286_vm6, 0, %v285_v7 }
  0x41   :  { %v121_v12 = vsub.s32 32, %v120_v10  ;;  %v122_v13 = vshll.u32 %v113_v3, %v120_v10  ;;  %v125_v14 = vsub.s32 4294967266, %v120_v10 }
  0x43   :  { %v123_v15 = vshrl.u32 %v105_v9, %v121_v12  ;;  %v126_v16 = vadd.s32 127, %v125_v14 }
  0x45   :  { %v124_v17 = vor.u32 %v123_v15, %v122_v13  ;;  %v127_v18 = vshll.u32 %v126_v16, 23 }
  0x47   :  { %v128_v19 = vor.u32 4788187, %v127_v18  ;;  %v131_v20 = vcvt.s32.f32 %v124_v17 }
  0x49   :  { %v129_v21 = vand.u32 2147483647, %v128_v19 }
  0x4b   :  { %v132_v22 = vmul.f32 %v131_v20, %v129_v21 }
  0x4d   :  { %v133_v24 = vxor.u32 2147483648, %v132_v22 }
  0x4f   :  { %v134_v25 = vsel %vm51_vm7, %v133_v24, %v132_v22 }
  0x50   :  { %v137_v27 = vsel %vm50_vm8, %v383_v8, %v134_v25 }
  0x51   :  { %305 = vcosq.f32 %v137_v27 }
  0x52   :  { %307 = vsinq.f32 %v137_v27 }
  0x5e   :  { %v306_v35 = vpop.eup %305 }
  0x5f   :  { %v308_v37 = vpop.eup %307  ;;  %v149_v38 = vxor.u32 2147483648, %v306_v35 }
  0x60   :  { %v146_v39 = vxor.u32 2147483648, %v308_v37 }
  0x61   :  { %v150_v40 = vsel %vm148_vm10, %v149_v38, %v308_v37  ;;  %v253_v41 = vsel %vm251_vm11, %v149_v38, %v308_v37 }
  0x62   :  { %v147_v42 = vsel %vm145_vm12, %v306_v35, %v146_v39  ;;  %v250_v43 = vsel %vm248_vm13, %v306_v35, %v146_v39 }
  0x63   :  { %v151_v2 = vsel %vm144_vm14, %v147_v42, %v150_v40  ;;  %v254_v44 = vsel %vm247_vm15, %v250_v43, %v253_v41 }
  0x64   :  { %v152_v46 = vsel %vm141_vm0, nan, %v151_v2  ;;  %v255_v47 = vsel %vm141_vm0, nan, %v254_v44 }
  0x65   :  { %v262_v48 = vsel %vm261_vm1, %v152_v46, %v255_v47 }
  0x66   :  { %v264_v49 = vmul.f32 %v263_v45, %v262_v48 }
  0x68   :  { %v265_v50 = vadd.f32 %v264_v49, %v263_v45 }
  0x6a   :  { %266 = vst [vmem:[#allocation3] sm:$0x3] %v265_v50 }
  0x6b   :  { %320 = shalt.err (!%p317_p4)
}
  0x6c   :  { %276 = dma.vmem_to_hbm [thread:$0]  %s274_s25, 32, %s420_s6, [#allocation4]  }
  0x6d   :  { %329 = dma.done.wait [#allocation4], 32  }
  0x6e   :  { %330 = vsyncadd [#allocation4], 4294967264 }
  0x6f   :  { %280 = vsyncpa [#allocation4], 1 }

</bundles_post_ra>
